<compile_context>
chip_gen: v7x
topology: tpu7x:2x2x1
jax: 0.10.0
libtpu: 0.0.40
codegen_flags: <defaults>
</compile_context>

<pallas_src>
import jax
import jax.numpy as jnp
from jax.experimental import pallas as pl
from jax.experimental.pallas import tpu as pltpu

ROWS = 30
OUT_ROWS = 17           # rows [0, 1, ..., 15, 17]
LANES = 128             # lane-dense padded width
OUT_IDX = tuple(range(16)) + (17,)


def _net_kernel(wxy_ref, o_ref):
    # Elementwise hot path on one vreg: row0 * row1 * row2 -> (1, 128),
    # written with a single full-width (unmasked) store.
    o_ref[...] = wxy_ref[0:1, :] * wxy_ref[1:2, :] * wxy_ref[2:3, :]


def net_with_tensor_constants(w, x, y):
    """JAX/Pallas equivalent of NetWithTensorConstants.forward(x, y)."""
    assert w.shape == (ROWS, 1) and x.shape == (ROWS, 1) and y.shape == (ROWS, 1)

    # Pack the three operands into a single lane-dense (3, 128) slab so the
    # kernel issues exactly one HBM->VMEM DMA and works on full 128-lane rows.
    stacked = jnp.stack(
        [w.reshape(ROWS), x.reshape(ROWS), y.reshape(ROWS)], axis=0
    ).astype(jnp.float32)                                    # (3, 30)
    packed = jnp.zeros((3, LANES), dtype=jnp.float32).at[:, :ROWS].set(stacked)

    z_padded = pl.pallas_call(
        _net_kernel,
        out_shape=jax.ShapeDtypeStruct((1, LANES), jnp.float32),
        in_specs=[pl.BlockSpec(memory_space=pltpu.VMEM)],
        out_specs=pl.BlockSpec(memory_space=pltpu.VMEM),
        cost_estimate=pl.CostEstimate(
            flops=2 * LANES,
            transcendentals=0,
            bytes_accessed=4 * (3 * LANES + LANES),
        ),
    )(packed)

    # Layout plumbing back to the module's output: gather rows [0..15, 17] of
    # z = w * x * y and reshape to (17, 1). Done in plain XLA (fuses away).
    idx = jnp.asarray(OUT_IDX, dtype=jnp.int32)
    return z_padded[0, idx].reshape(OUT_ROWS, 1)


if __name__ == "__main__":
    key = jax.random.PRNGKey(0)
    kw, kx, ky = jax.random.split(key, 3)

    # Deterministic "parameter" (the module's tensor constant) and inputs.
    w = jax.random.normal(kw, (ROWS, 1), dtype=jnp.float32)
    x = jax.random.normal(kx, (ROWS, 1), dtype=jnp.float32)
    y = jax.random.normal(ky, (ROWS, 1), dtype=jnp.float32)

    out = net_with_tensor_constants(w, x, y)
    jax.block_until_ready(out)

    # Reference check in plain JAX.
    idx = jnp.asarray(OUT_IDX, dtype=jnp.int32)
    ref = (w * x * y)[idx]
    assert out.shape == (OUT_ROWS, 1)
    assert jnp.allclose(out, ref, atol=1e-6, rtol=1e-6)

    print("KERNEL_OK")
</pallas_src>

<mosaic_0001>
module attributes {stable_mosaic.version = 11 : i64} {
  func.func @_net_kernel(%arg0: memref<3x128xf32, #tpu.memory_space<vmem>>, %arg1: memref<1x128xf32, #tpu.memory_space<vmem>>) attributes {dimension_semantics = [], scalar_prefetch = 0 : i64, scratch_operands = 0 : i64, tpu.core_type = #tpu.core_type<tc>} {
    %c0 = arith.constant 0 : index
    %c0_0 = arith.constant 0 : index
    %0 = vector.load %arg0[%c0, %c0_0] : memref<3x128xf32, #tpu.memory_space<vmem>>, vector<1x128xf32>
    %c1 = arith.constant 1 : index
    %c0_1 = arith.constant 0 : index
    %1 = vector.load %arg0[%c1, %c0_1] : memref<3x128xf32, #tpu.memory_space<vmem>>, vector<1x128xf32>
    %2 = arith.mulf %0, %1 : vector<1x128xf32>
    %c2 = arith.constant 2 : index
    %c0_2 = arith.constant 0 : index
    %3 = vector.load %arg0[%c2, %c0_2] : memref<3x128xf32, #tpu.memory_space<vmem>>, vector<1x128xf32>
    %4 = arith.mulf %2, %3 : vector<1x128xf32>
    %c0_3 = arith.constant 0 : index
    %c0_4 = arith.constant 0 : index
    %5 = vector.load %arg1[%c0_3, %c0_4] : memref<1x128xf32, #tpu.memory_space<vmem>>, vector<1x128xf32>
    tpu.vector_store %arg1[%c0_3, %c0_4], %4 {strides = array<i32>} : memref<1x128xf32, #tpu.memory_space<vmem>>, vector<1x128xf32>,
    return
  }
}

</mosaic_0001>

<bundles_post_ra>
// kernel: tpu_custom_call.1
= control target key start
LH: loop header
LB: loop body
LE: loop exit
PB: predicated region body
PF: predicated region fallthrough
CT: control target
= control target key end

     0   :  { %6 = vsyncpa [#allocation3], 0  ;;  %s128_s0 = inlined_call_operand.hbm [shape: f32[3,128], index: 0, kind: input, shape index: {}]   ;;  %s129_s1 = inlined_call_operand.hbm [shape: f32[1,128], index: 1, kind: output, shape index: {}]  }
   0x1   :  { %7 = vsyncpa [#allocation4], 0  ;;  %s92_s6 = smov [#allocation2]   ;;  %s44_s10 = scalar_lea.hbm %s128_s0, 64 }
   0x2   :  { %s14_s7 = sshll.u32 %s92_s6, 4  ;;  %p45_p0 = scmp.ne.s32.totalorder %s128_s0, %s44_s10  ;;  %s15_s7 = int_to_ptr.vmem [resolvable:$true] %s14_s7 }
   0x3   :  { %p48_p1 = scmp.lt.u32.totalorder %s44_s10, %s128_s0 }
   0x5   :  { %p50_p2 = pnand %p48_p1, %p45_p0 }
   0x7   :  { %53 = shalt.err (!%p50_p2)
}
   0x8   :  { %s54_s15 = scalar_lea.vmem %s15_s7, 64  ;;  %p59_p4 = scmp.lt.s32.totalorder %s15_s7, %s15_s7 }
   0x9   :  { %p55_p3 = scmp.ne.s32.totalorder %s15_s7, %s54_s15  ;;  %p60_p5 = scmp.lt.s32.totalorder %s54_s15, %s54_s15 }
   0xb   :  { %p61_p6 = por %p60_p5, %p59_p4 }
   0xd   :  { %p62_p7 = pnand %p61_p6, %p55_p3 }
   0xf   :  { %65 = shalt.err (!%p62_p7)
}
  0x10   :  { %17 = dma.hbm_to_vmem [thread:$0]  %s128_s0, 64, %s15_s7, [#allocation3]  }
  0x11   :  { %88 = dma.done.wait [#allocation3], 64  }
  0x12   :  { %89 = vsyncadd [#allocation3], 4294967232  ;;  %s93_s18 = smov [#allocation5]   ;;  %v21_v0 = vld [vmem:[#allocation2] sm:$0x1] }
  0x13   :  { %s33_s19 = sshll.u32 %s93_s18, 4  ;;  %v22_v1 = vld [vmem:[#allocation2 + $0x1] sm:$0x1]  ;;  %v24_v2 = vld [vmem:[#allocation2 + $0x2] sm:$0x1]  ;;  %s34_s19 = int_to_ptr.vmem [resolvable:$true] %s33_s19 }
  0x14   :  { %v23_v3 = vmul.f32 %v22_v1, %v21_v0  ;;  %s66_s20 = scalar_lea.vmem %s34_s19, 16  ;;  %s70_s21 = scalar_lea.vmem %s34_s19, 32 }
  0x15   :  { %p67_p8 = scmp.ne.s32.totalorder %s34_s19, %s66_s20  ;;  %p71_p9 = scmp.lt.s32.totalorder %s34_s19, %s34_s19 }
  0x16   :  { %v25_v4 = vmul.f32 %v24_v2, %v23_v3  ;;  %p72_p10 = scmp.lt.s32.totalorder %s70_s21, %s66_s20 }
  0x18   :  { %26 = vst [vmem:[#allocation5] sm:$0x1] %v25_v4  ;;  %p73_p11 = por %p72_p10, %p71_p9 }
  0x1a   :  { %p74_p12 = pnand %p73_p11, %p67_p8 }
  0x1c   :  { %77 = shalt.err (!%p74_p12)
}
  0x1d   :  { %s78_s23 = scalar_lea.hbm %s129_s1, 16 }
  0x1e   :  { %p79_p13 = scmp.ne.s32.totalorder %s129_s1, %s78_s23  ;;  %p82_p0 = scmp.lt.u32.totalorder %s78_s23, %s129_s1 }
  0x20   :  { %p84_p1 = pnand %p82_p0, %p79_p13 }
  0x22   :  { %87 = shalt.err (!%p84_p1)
}
  0x23   :  { %36 = dma.vmem_to_hbm [thread:$0]  %s34_s19, 16, %s129_s1, [#allocation4]  }
  0x24   :  { %90 = dma.done.wait [#allocation4], 16  }
  0x25   :  { %91 = vsyncadd [#allocation4], 4294967280 }
  0x26   :  { %40 = vsyncpa [#allocation3], 1 }
  0x27   :  { %41 = vsyncpa [#allocation4], 1 }

</bundles_post_ra>
